<compile_context>
chip_gen: v6e
topology: v6e:2x2x1
jax: 0.10.0
libtpu: 0.0.40
codegen_flags: <defaults>
</compile_context>

<pallas_src>
import jax
import jax.numpy as jnp
from jax.experimental import pallas as pl
from jax.experimental.pallas import tpu as pltpu


def _encoder_kernel(adj_ref, x_ref,
                    wil_ref, wir_ref, bi_ref,
                    wml_ref, wmr_ref, bm_ref,
                    wol_ref, wor_ref, bo_ref,
                    o_ref):
    f32 = jnp.float32
    bf16 = jnp.bfloat16

    adj = adj_ref[...]                        # [N, N] bf16, VMEM-resident for all layers
    n = adj.shape[0]

    # ---- conv_in -> tanh (dropout: eval-mode identity) ----
    h = x_ref[...]                                            # [N, Fin] bf16
    agg = jnp.dot(adj, h, preferred_element_type=f32)         # neighbor sum, MXU, f32 acc
    z = (jnp.dot(agg.astype(bf16), wil_ref[...], preferred_element_type=f32)
         + jnp.dot(h, wir_ref[...], preferred_element_type=f32)
         + bi_ref[...])
    h = jnp.tanh(z).astype(bf16)                              # [N, H]

    # ---- 2x conv_med (shared weights) -> tanh ----
    w_ml = wml_ref[...]
    w_mr = wmr_ref[...]
    b_m = jnp.broadcast_to(bm_ref[...], (n, bm_ref.shape[1]))  # hoisted broadcast
    for _ in range(2):                                          # unrolled at trace time
        agg = jnp.dot(adj, h, preferred_element_type=f32)
        z = (jnp.dot(agg.astype(bf16), w_ml, preferred_element_type=f32)
             + jnp.dot(h, w_mr, preferred_element_type=f32)
             + b_m)
        h = jnp.tanh(z).astype(bf16)

    # ---- conv_out (no activation); Fout < Fin so re-associate: A @ (h @ Wl^T) ----
    p_l = jnp.dot(h, wol_ref[...], preferred_element_type=f32).astype(bf16)
    out = (jnp.dot(adj, p_l, preferred_element_type=f32)
           + jnp.dot(h, wor_ref[...], preferred_element_type=f32)
           + bo_ref[...])
    o_ref[...] = out.astype(o_ref.dtype)


def _full_vmem_spec(shape):
    # Whole-array block (N=128 fits trivially in VMEM on v5e/v6e/v7x).
    return pl.BlockSpec(shape, lambda i: (0,) * len(shape), memory_space=pltpu.VMEM)


def prep_kernel_params(params):
    """Cast weights to bf16 (MXU inputs) and keep biases in f32 [1, Fout]."""
    def prep(p):
        wl_t, wr_t, b = p
        return (wl_t.astype(jnp.bfloat16),
                wr_t.astype(jnp.bfloat16),
                b.astype(jnp.float32))
    return {k: prep(v) for k, v in params.items()}


def gnn_encoder_forward(x, adj, params):
    """Fused GNNEncoder forward.

    x:      [N, Fin] f32 node features
    adj:    [N, N]   f32 dense adjacency counts (A[i, j] = #edges j -> i)
    params: dict conv_in/conv_med/conv_out of (W_l^T [Fin,Fout], W_r^T [Fin,Fout], b_l [1,Fout])
    """
    n, f_in = x.shape
    hid = params["conv_in"][0].shape[1]
    out_c = params["conv_out"][0].shape[1]

    kp = prep_kernel_params(params)
    adj_b = adj.astype(jnp.bfloat16)        # counts <= 256 -> exact in bf16
    x_b = x.astype(jnp.bfloat16)

    args = (adj_b, x_b,
            *kp["conv_in"], *kp["conv_med"], *kp["conv_out"])

    # flops = 2 * MACs per matmul (agg + two projections per layer; out layer re-associated)
    flops = (
        2 * n * n * f_in + 4 * n * f_in * hid          # conv_in
        + 2 * (2 * n * n * hid + 4 * n * hid * hid)    # conv_med x2
        + 4 * n * hid * out_c + 2 * n * n * out_c      # conv_out (re-associated)
    )
    cost = pl.CostEstimate(
        flops=int(flops),
        transcendentals=int(3 * n * hid),              # tanh after in/med/med
        bytes_accessed=int(sum(a.size * a.dtype.itemsize for a in args)
                           + n * out_c * 4),
    )

    return pl.pallas_call(
        _encoder_kernel,
        out_shape=jax.ShapeDtypeStruct((n, out_c), jnp.float32),
        grid=(1,),
        in_specs=[_full_vmem_spec(a.shape) for a in args],
        out_specs=_full_vmem_spec((n, out_c)),
        compiler_params=pltpu.CompilerParams(
            dimension_semantics=("arbitrary",)),
        cost_estimate=cost,
    )(*args)


def init_sage_params(key, fin, fout):
    """Deterministic synthetic init of one SAGEConv's parameters."""
    k1, k2, k3 = jax.random.split(key, 3)
    scale = 1.0 / jnp.sqrt(jnp.float32(fin))
    w_l = jax.random.uniform(k1, (fout, fin), jnp.float32, -scale, scale)  # lin_l.weight
    w_r = jax.random.uniform(k2, (fout, fin), jnp.float32, -scale, scale)  # lin_r.weight
    b_l = jax.random.uniform(k3, (fout,), jnp.float32, -scale, scale)       # lin_l.bias
    # pre-transpose for the kernel
    return w_l.T, w_r.T, b_l.reshape(1, fout)


def _reference_forward_f32(x, adj, params):
    """Plain-JAX f32 reference with the original module's math."""
    def layer(h, p, act):
        wl_t, wr_t, b = p
        o = (adj @ h) @ wl_t + h @ wr_t + b
        return jnp.tanh(o) if act else o

    h = layer(x, params["conv_in"], True)
    for _ in range(2):
        h = layer(h, params["conv_med"], True)
    return layer(h, params["conv_out"], False)


def _reference_forward_bf16(x, adj, params):
    """Plain-JAX reference mirroring the kernel's bf16-in / f32-accumulate scheme."""
    kp = prep_kernel_params(params)
    bf16, f32 = jnp.bfloat16, jnp.float32
    adj_b = adj.astype(bf16)
    h = x.astype(bf16)

    def std_layer(h, wl, wr, b):
        agg = jnp.dot(adj_b, h, preferred_element_type=f32)
        z = (jnp.dot(agg.astype(bf16), wl, preferred_element_type=f32)
             + jnp.dot(h, wr, preferred_element_type=f32) + b)
        return jnp.tanh(z).astype(bf16)

    h = std_layer(h, *kp["conv_in"])
    for _ in range(2):
        h = std_layer(h, *kp["conv_med"])
    wl, wr, b = kp["conv_out"]
    p = jnp.dot(h, wl, preferred_element_type=f32).astype(bf16)
    return (jnp.dot(adj_b, p, preferred_element_type=f32)
            + jnp.dot(h, wr, preferred_element_type=f32) + b)


if __name__ == "__main__":
    N = 128           # number of nodes
    F_IN = 8          # input feature dim
    HIDDEN = 32       # hidden_channels
    OUT = 16          # out_channels
    E = 512           # number of edges

    root = jax.random.PRNGKey(0)
    k_x, k_src, k_dst, k_in, k_med, k_out = jax.random.split(root, 6)

    # node features and edge_index [2, E] (row 0 = source j, row 1 = target i)
    x = jax.random.normal(k_x, (N, F_IN), jnp.float32)
    src = jax.random.randint(k_src, (E,), 0, N)
    dst = jax.random.randint(k_dst, (E,), 0, N)

    # dense adjacency counts: A[i, j] = number of edges j -> i  (glue, plain JAX)
    adj = jnp.zeros((N, N), jnp.float32).at[dst, src].add(1.0)

    params = {
        "conv_in": init_sage_params(k_in, F_IN, HIDDEN),
        "conv_med": init_sage_params(k_med, HIDDEN, HIDDEN),
        "conv_out": init_sage_params(k_out, HIDDEN, OUT),
    }

    out = gnn_encoder_forward(x, adj, params)
    out = jax.block_until_ready(out)
    assert out.shape == (N, OUT)

    # Tight check vs a plain-JAX reference that matches the kernel's precision.
    ref_matched = _reference_forward_bf16(x, adj, params)
    err_m = float(jnp.max(jnp.abs(out - ref_matched)))
    assert jnp.allclose(out, ref_matched, atol=5e-3, rtol=5e-3), err_m

    # Loose sanity check vs the exact f32 math of the original module
    # (difference is only bf16 input/activation quantization).
    ref_f32 = _reference_forward_f32(x, adj, params)
    err_f = float(jnp.max(jnp.abs(out - ref_f32)))
    assert jnp.allclose(out, ref_f32, atol=1.5e-1, rtol=1e-1), err_f

    print("KERNEL_OK")
</pallas_src>

<mosaic_0001>
module attributes {stable_mosaic.version = 11 : i64} {
  func.func @_encoder_kernel(%arg0: i32, %arg1: memref<128x128xbf16, #tpu.memory_space<vmem>>, %arg2: memref<128x8xbf16, #tpu.memory_space<vmem>>, %arg3: memref<8x32xbf16, #tpu.memory_space<vmem>>, %arg4: memref<8x32xbf16, #tpu.memory_space<vmem>>, %arg5: memref<1x32xf32, #tpu.memory_space<vmem>>, %arg6: memref<32x32xbf16, #tpu.memory_space<vmem>>, %arg7: memref<32x32xbf16, #tpu.memory_space<vmem>>, %arg8: memref<1x32xf32, #tpu.memory_space<vmem>>, %arg9: memref<32x16xbf16, #tpu.memory_space<vmem>>, %arg10: memref<32x16xbf16, #tpu.memory_space<vmem>>, %arg11: memref<1x16xf32, #tpu.memory_space<vmem>>, %arg12: memref<128x16xf32, #tpu.memory_space<vmem>>) attributes {dimension_semantics = [#tpu.dimension_semantics<arbitrary>], iteration_bounds = array<i64: 1>, scalar_prefetch = 0 : i64, scratch_operands = 0 : i64, tpu.core_type = #tpu.core_type<tc>, window_params = [{pipeline_mode = #tpu.pipeline_mode<synchronous>, transform_indices = @transform_0, window_bounds = array<i64: 128, 128>}, {pipeline_mode = #tpu.pipeline_mode<synchronous>, transform_indices = @transform_1, window_bounds = array<i64: 128, 8>}, {pipeline_mode = #tpu.pipeline_mode<synchronous>, transform_indices = @transform_2, window_bounds = array<i64: 8, 32>}, {pipeline_mode = #tpu.pipeline_mode<synchronous>, transform_indices = @transform_3, window_bounds = array<i64: 8, 32>}, {pipeline_mode = #tpu.pipeline_mode<synchronous>, transform_indices = @transform_4, window_bounds = array<i64: 1, 32>}, {pipeline_mode = #tpu.pipeline_mode<synchronous>, transform_indices = @transform_5, window_bounds = array<i64: 32, 32>}, {pipeline_mode = #tpu.pipeline_mode<synchronous>, transform_indices = @transform_6, window_bounds = array<i64: 32, 32>}, {pipeline_mode = #tpu.pipeline_mode<synchronous>, transform_indices = @transform_7, window_bounds = array<i64: 1, 32>}, {pipeline_mode = #tpu.pipeline_mode<synchronous>, transform_indices = @transform_8, window_bounds = array<i64: 32, 16>}, {pipeline_mode = #tpu.pipeline_mode<synchronous>, transform_indices = @transform_9, window_bounds = array<i64: 32, 16>}, {pipeline_mode = #tpu.pipeline_mode<synchronous>, transform_indices = @transform_10, window_bounds = array<i64: 1, 16>}, {pipeline_mode = #tpu.pipeline_mode<synchronous>, transform_indices = @transform_11, window_bounds = array<i64: 128, 16>}]} {
    %c0 = arith.constant 0 : index
    %c0_0 = arith.constant 0 : index
    %0 = vector.load %arg1[%c0, %c0_0] : memref<128x128xbf16, #tpu.memory_space<vmem>>, vector<128x128xbf16>
    %c0_1 = arith.constant 0 : index
    %c0_2 = arith.constant 0 : index
    %1 = vector.load %arg2[%c0_1, %c0_2] : memref<128x8xbf16, #tpu.memory_space<vmem>>, vector<128x8xbf16>
    %cst = arith.constant dense<0.000000e+00> : vector<128x8xf32>
    %2 = tpu.matmul %0, %1, %cst {dimension_numbers = #tpu.dot_dimension_numbers<[1], [0], [0], [1], [0, 0, 1, 1], [], []>} : vector<128x128xbf16>, vector<128x8xbf16>, vector<128x8xf32> -> vector<128x8xf32>
    %3 = arith.truncf %2 : vector<128x8xf32> to vector<128x8xbf16>
    %c0_3 = arith.constant 0 : index
    %c0_4 = arith.constant 0 : index
    %4 = vector.load %arg3[%c0_3, %c0_4] : memref<8x32xbf16, #tpu.memory_space<vmem>>, vector<8x32xbf16>
    %cst_5 = arith.constant dense<0.000000e+00> : vector<128x32xf32>
    %5 = tpu.matmul %3, %4, %cst_5 {dimension_numbers = #tpu.dot_dimension_numbers<[1], [0], [0], [1], [0, 0, 1, 1], [], []>} : vector<128x8xbf16>, vector<8x32xbf16>, vector<128x32xf32> -> vector<128x32xf32>
    %c0_6 = arith.constant 0 : index
    %c0_7 = arith.constant 0 : index
    %6 = vector.load %arg4[%c0_6, %c0_7] : memref<8x32xbf16, #tpu.memory_space<vmem>>, vector<8x32xbf16>
    %cst_8 = arith.constant dense<0.000000e+00> : vector<128x32xf32>
    %7 = tpu.matmul %1, %6, %cst_8 {dimension_numbers = #tpu.dot_dimension_numbers<[1], [0], [0], [1], [0, 0, 1, 1], [], []>} : vector<128x8xbf16>, vector<8x32xbf16>, vector<128x32xf32> -> vector<128x32xf32>
    %8 = arith.addf %5, %7 : vector<128x32xf32>
    %c0_9 = arith.constant 0 : index
    %c0_10 = arith.constant 0 : index
    %9 = vector.load %arg5[%c0_9, %c0_10] : memref<1x32xf32, #tpu.memory_space<vmem>>, vector<1x32xf32>
    %10 = vector.broadcast %9 : vector<1x32xf32> to vector<128x32xf32>
    %11 = arith.addf %8, %10 : vector<128x32xf32>
    %12 = math.tanh %11 : vector<128x32xf32>
    %13 = arith.truncf %12 : vector<128x32xf32> to vector<128x32xbf16>
    %c0_11 = arith.constant 0 : index
    %c0_12 = arith.constant 0 : index
    %14 = vector.load %arg6[%c0_11, %c0_12] : memref<32x32xbf16, #tpu.memory_space<vmem>>, vector<32x32xbf16>
    %c0_13 = arith.constant 0 : index
    %c0_14 = arith.constant 0 : index
    %15 = vector.load %arg7[%c0_13, %c0_14] : memref<32x32xbf16, #tpu.memory_space<vmem>>, vector<32x32xbf16>
    %c0_15 = arith.constant 0 : index
    %c0_16 = arith.constant 0 : index
    %16 = vector.load %arg8[%c0_15, %c0_16] : memref<1x32xf32, #tpu.memory_space<vmem>>, vector<1x32xf32>
    %17 = vector.shape_cast %16 : vector<1x32xf32> to vector<1x32xf32>
    %18 = vector.broadcast %17 : vector<1x32xf32> to vector<128x32xf32>
    %cst_17 = arith.constant dense<0.000000e+00> : vector<128x32xf32>
    %19 = tpu.matmul %0, %13, %cst_17 {dimension_numbers = #tpu.dot_dimension_numbers<[1], [0], [0], [1], [0, 0, 1, 1], [], []>} : vector<128x128xbf16>, vector<128x32xbf16>, vector<128x32xf32> -> vector<128x32xf32>
    %20 = arith.truncf %19 : vector<128x32xf32> to vector<128x32xbf16>
    %cst_18 = arith.constant dense<0.000000e+00> : vector<128x32xf32>
    %21 = tpu.matmul %20, %14, %cst_18 {dimension_numbers = #tpu.dot_dimension_numbers<[1], [0], [0], [1], [0, 0, 1, 1], [], []>} : vector<128x32xbf16>, vector<32x32xbf16>, vector<128x32xf32> -> vector<128x32xf32>
    %cst_19 = arith.constant dense<0.000000e+00> : vector<128x32xf32>
    %22 = tpu.matmul %13, %15, %cst_19 {dimension_numbers = #tpu.dot_dimension_numbers<[1], [0], [0], [1], [0, 0, 1, 1], [], []>} : vector<128x32xbf16>, vector<32x32xbf16>, vector<128x32xf32> -> vector<128x32xf32>
    %23 = arith.addf %21, %22 : vector<128x32xf32>
    %24 = arith.addf %23, %18 : vector<128x32xf32>
    %25 = math.tanh %24 : vector<128x32xf32>
    %26 = arith.truncf %25 : vector<128x32xf32> to vector<128x32xbf16>
    %cst_20 = arith.constant dense<0.000000e+00> : vector<128x32xf32>
    %27 = tpu.matmul %0, %26, %cst_20 {dimension_numbers = #tpu.dot_dimension_numbers<[1], [0], [0], [1], [0, 0, 1, 1], [], []>} : vector<128x128xbf16>, vector<128x32xbf16>, vector<128x32xf32> -> vector<128x32xf32>
    %28 = arith.truncf %27 : vector<128x32xf32> to vector<128x32xbf16>
    %cst_21 = arith.constant dense<0.000000e+00> : vector<128x32xf32>
    %29 = tpu.matmul %28, %14, %cst_21 {dimension_numbers = #tpu.dot_dimension_numbers<[1], [0], [0], [1], [0, 0, 1, 1], [], []>} : vector<128x32xbf16>, vector<32x32xbf16>, vector<128x32xf32> -> vector<128x32xf32>
    %cst_22 = arith.constant dense<0.000000e+00> : vector<128x32xf32>
    %30 = tpu.matmul %26, %15, %cst_22 {dimension_numbers = #tpu.dot_dimension_numbers<[1], [0], [0], [1], [0, 0, 1, 1], [], []>} : vector<128x32xbf16>, vector<32x32xbf16>, vector<128x32xf32> -> vector<128x32xf32>
    %31 = arith.addf %29, %30 : vector<128x32xf32>
    %32 = arith.addf %31, %18 : vector<128x32xf32>
    %33 = math.tanh %32 : vector<128x32xf32>
    %34 = arith.truncf %33 : vector<128x32xf32> to vector<128x32xbf16>
    %c0_23 = arith.constant 0 : index
    %c0_24 = arith.constant 0 : index
    %35 = vector.load %arg9[%c0_23, %c0_24] : memref<32x16xbf16, #tpu.memory_space<vmem>>, vector<32x16xbf16>
    %cst_25 = arith.constant dense<0.000000e+00> : vector<128x16xf32>
    %36 = tpu.matmul %34, %35, %cst_25 {dimension_numbers = #tpu.dot_dimension_numbers<[1], [0], [0], [1], [0, 0, 1, 1], [], []>} : vector<128x32xbf16>, vector<32x16xbf16>, vector<128x16xf32> -> vector<128x16xf32>
    %37 = arith.truncf %36 : vector<128x16xf32> to vector<128x16xbf16>
    %cst_26 = arith.constant dense<0.000000e+00> : vector<128x16xf32>
    %38 = tpu.matmul %0, %37, %cst_26 {dimension_numbers = #tpu.dot_dimension_numbers<[1], [0], [0], [1], [0, 0, 1, 1], [], []>} : vector<128x128xbf16>, vector<128x16xbf16>, vector<128x16xf32> -> vector<128x16xf32>
    %c0_27 = arith.constant 0 : index
    %c0_28 = arith.constant 0 : index
    %39 = vector.load %arg10[%c0_27, %c0_28] : memref<32x16xbf16, #tpu.memory_space<vmem>>, vector<32x16xbf16>
    %cst_29 = arith.constant dense<0.000000e+00> : vector<128x16xf32>
    %40 = tpu.matmul %34, %39, %cst_29 {dimension_numbers = #tpu.dot_dimension_numbers<[1], [0], [0], [1], [0, 0, 1, 1], [], []>} : vector<128x32xbf16>, vector<32x16xbf16>, vector<128x16xf32> -> vector<128x16xf32>
    %41 = arith.addf %38, %40 : vector<128x16xf32>
    %c0_30 = arith.constant 0 : index
    %c0_31 = arith.constant 0 : index
    %42 = vector.load %arg11[%c0_30, %c0_31] : memref<1x16xf32, #tpu.memory_space<vmem>>, vector<1x16xf32>
    %43 = vector.broadcast %42 : vector<1x16xf32> to vector<128x16xf32>
    %44 = arith.addf %41, %43 : vector<128x16xf32>
    %c0_32 = arith.constant 0 : index
    %c0_33 = arith.constant 0 : index
    %45 = vector.load %arg12[%c0_32, %c0_33] : memref<128x16xf32, #tpu.memory_space<vmem>>, vector<128x16xf32>
    tpu.vector_store %arg12[%c0_32, %c0_33], %44 {strides = array<i32>} : memref<128x16xf32, #tpu.memory_space<vmem>>, vector<128x16xf32>,
    return
  }
  func.func @transform_0(%arg0: i32) -> (i32, i32) {
    %c0_i32 = arith.constant 0 : i32
    %c0_i32_0 = arith.constant 0 : i32
    %c0_i32_1 = arith.constant 0 : i32
    return %c0_i32, %c0_i32_0 : i32, i32
  }
  func.func @transform_1(%arg0: i32) -> (i32, i32) {
    %c0_i32 = arith.constant 0 : i32
    %c0_i32_0 = arith.constant 0 : i32
    %c0_i32_1 = arith.constant 0 : i32
    return %c0_i32, %c0_i32_0 : i32, i32
  }
  func.func @transform_2(%arg0: i32) -> (i32, i32) {
    %c0_i32 = arith.constant 0 : i32
    %c0_i32_0 = arith.constant 0 : i32
    %c0_i32_1 = arith.constant 0 : i32
    return %c0_i32, %c0_i32_0 : i32, i32
  }
  func.func @transform_3(%arg0: i32) -> (i32, i32) {
    %c0_i32 = arith.constant 0 : i32
    %c0_i32_0 = arith.constant 0 : i32
    %c0_i32_1 = arith.constant 0 : i32
    return %c0_i32, %c0_i32_0 : i32, i32
  }
  func.func @transform_4(%arg0: i32) -> (i32, i32) {
    %c0_i32 = arith.constant 0 : i32
    %c0_i32_0 = arith.constant 0 : i32
    %c0_i32_1 = arith.constant 0 : i32
    return %c0_i32, %c0_i32_0 : i32, i32
  }
  func.func @transform_5(%arg0: i32) -> (i32, i32) {
    %c0_i32 = arith.constant 0 : i32
    %c0_i32_0 = arith.constant 0 : i32
    %c0_i32_1 = arith.constant 0 : i32
    return %c0_i32, %c0_i32_0 : i32, i32
  }
  func.func @transform_6(%arg0: i32) -> (i32, i32) {
    %c0_i32 = arith.constant 0 : i32
    %c0_i32_0 = arith.constant 0 : i32
    %c0_i32_1 = arith.constant 0 : i32
    return %c0_i32, %c0_i32_0 : i32, i32
  }
  func.func @transform_7(%arg0: i32) -> (i32, i32) {
    %c0_i32 = arith.constant 0 : i32
    %c0_i32_0 = arith.constant 0 : i32
    %c0_i32_1 = arith.constant 0 : i32
    return %c0_i32, %c0_i32_0 : i32, i32
  }
  func.func @transform_8(%arg0: i32) -> (i32, i32) {
    %c0_i32 = arith.constant 0 : i32
    %c0_i32_0 = arith.constant 0 : i32
    %c0_i32_1 = arith.constant 0 : i32
    return %c0_i32, %c0_i32_0 : i32, i32
  }
  func.func @transform_9(%arg0: i32) -> (i32, i32) {
    %c0_i32 = arith.constant 0 : i32
    %c0_i32_0 = arith.constant 0 : i32
    %c0_i32_1 = arith.constant 0 : i32
    return %c0_i32, %c0_i32_0 : i32, i32
  }
  func.func @transform_10(%arg0: i32) -> (i32, i32) {
    %c0_i32 = arith.constant 0 : i32
    %c0_i32_0 = arith.constant 0 : i32
    %c0_i32_1 = arith.constant 0 : i32
    return %c0_i32, %c0_i32_0 : i32, i32
  }
  func.func @transform_11(%arg0: i32) -> (i32, i32) {
    %c0_i32 = arith.constant 0 : i32
    %c0_i32_0 = arith.constant 0 : i32
    %c0_i32_1 = arith.constant 0 : i32
    return %c0_i32, %c0_i32_0 : i32, i32
  }
}

</mosaic_0001>

<bundles_post_ra>
// kernel: tpu_custom_call.1
= control target key start
LH: loop header
LB: loop body
LE: loop exit
PB: predicated region body
PF: predicated region fallthrough
CT: control target
= control target key end

     0   :  { %vm274_vm0 = vcmask 64512   ;;  %vm299_vm1 = vcmask 1043456   ;;  %vm703_vm2 = vcmask 261120   ;;  %vm1763_vm3 = vcmask 130048   ;;  %s2904_s1 = inlined_call_operand.vmem [shape: bf16[128,8], index: 1, kind: input, shape index: {}]   ;;  %s2905_s0 = inlined_call_operand.vmem [shape: bf16[128,128], index: 0, kind: input, shape index: {}]   ;;  %s2906_s3 = inlined_call_operand.vmem [shape: bf16[8,32], index: 3, kind: input, shape index: {}]   ;;  %s2907_s2 = inlined_call_operand.vmem [shape: bf16[8,32], index: 2, kind: input, shape index: {}]   ;;  %s2908_s6 = inlined_call_operand.vmem [shape: bf16[32,32], index: 6, kind: input, shape index: {}]   ;;  %s2909_s5 = inlined_call_operand.vmem [shape: bf16[32,32], index: 5, kind: input, shape index: {}]   ;;  %s2910_s4 = inlined_call_operand.vmem [shape: f32[1,32], index: 4, kind: input, shape index: {}]   ;;  %s2911_s7 = inlined_call_operand.vmem [shape: f32[1,32], index: 7, kind: input, shape index: {}]   ;;  %s2912_s8 = inlined_call_operand.vmem [shape: bf16[32,16], index: 8, kind: input, shape index: {}]   ;;  %s2913_s9 = inlined_call_operand.vmem [shape: bf16[32,16], index: 9, kind: input, shape index: {}]   ;;  %s2914_s10 = inlined_call_operand.vmem [shape: f32[1,16], index: 10, kind: input, shape index: {}]   ;;  %s2915_s11 = inlined_call_operand.vmem [shape: f32[128,16], index: 11, kind: output, shape index: {}]  }
   0x1   :  { %v2319_v0 = vld [vmem:[%s2904_s1 + $0x38] sm:$0xff]   ;;  %v2320_v1 = vld [vmem:[%s2904_s1 + $0x30] sm:$0xff]   ;;  %v2321_v2 = vld [vmem:[%s2904_s1 + $0x28] sm:$0xff]  }
   0x2   :  { %2017 = vmatprep.subr.bf16.mxu0 %v2319_v0  ;;  %v2322_v3 = vld [vmem:[%s2904_s1 + $0x20] sm:$0xff]   ;;  %v2323_v6 = vld [vmem:[%s2904_s1 + $0x18] sm:$0xff]   ;;  %v2324_v7 = vld [vmem:[%s2904_s1 + $0x10] sm:$0xff]  }
   0x3   :  { %2018 = vmatpush3.bf16.msra.mxu0 %v2319_v0  ;;  %v2326_v4 = vld [vmem:[%s2904_s1] sm:$0xff]   ;;  %v2325_v11 = vld [vmem:[%s2904_s1 + $0x8] sm:$0xff]   ;;  %v2556_v14 = vld [vmem:[%s2905_s0 + $0x10] sm:$0xff]  }
   0x4   :  { %2019 = vmatprep.subr.bf16.mxu0 %v2320_v1  ;;  %v2525_v5 = vld [vmem:[%s2905_s0] sm:$0xff]   ;;  %2051 = vmatprep.mubr.msk.bf16.mxu1 %vm274_vm0, %v2326_v4  ;;  %v2550_v13 = vld [vmem:[%s2905_s0 + $0x8] sm:$0xff]   ;;  %v2564_v15 = vld [vmem:[%s2905_s0 + $0x18] sm:$0xff]  }
   0x5   :  { %2033 = vmatprep.mubr.bf16.mxu0 %v2525_v5  ;;  %v273_v8 = vld [vmem:[%s2906_s3] sm:$0xf]  ;;  %v2578_v17 = vld [vmem:[%s2905_s0 + $0x28] sm:$0xff]   ;;  %v2583_v18 = vld [vmem:[%s2905_s0 + $0x30] sm:$0xff]  }
   0x6   :  { %v272_v9 = vld [vmem:[%s2907_s2] sm:$0xf]  ;;  %2317 = vmatprep.subr.msk.bf16.mxu1 %vm299_vm1, %v273_v8  ;;  %v301_v10 = vsel %vm299_vm1, %v273_v8, 0  ;;  %v2590_v19 = vld [vmem:[%s2905_s0 + $0x38] sm:$0xff]  }
   0x7   :  { %2020 = vmatpush3.bf16.msra.mxu0 %v2320_v1  ;;  %2050 = vmatpush3.bf16.msra.mxu1 %v301_v10  ;;  %v425_v12 = vsel %vm299_vm1, %v272_v9, 0  ;;  %v2570_v16 = vld [vmem:[%s2905_s0 + $0x20] sm:$0xff]  }
   0x8   :  { %2021 = vmatprep.subr.bf16.mxu0 %v2321_v2  ;;  %2318 = vmatprep.subr.msk.bf16.mxu1 %vm299_vm1, %v272_v9 }
   0xa   :  { %2052 = vmatmul.mubr.msk.bf16.vlgmr.msra.gmra.mxu1 %vm274_vm0, %v2325_v11 }
   0xb   :  { %2022 = vmatpush3.bf16.msra.mxu0 %v2321_v2  ;;  %2055 = vmatprep.mubr.msk.bf16.mxu1 %vm274_vm0, %v2324_v7 }
   0xc   :  { %2023 = vmatprep.subr.bf16.mxu0 %v2322_v3  ;;  %2068 = vmatpush3.bf16.msra.mxu1 %v425_v12  ;;  %v2616_v12 = vld [vmem:[%s2910_s4] ss:$0 sm:$0xff] }
   0xf   :  { %2024 = vmatpush3.bf16.msra.mxu0 %v2322_v3 }
  0x10   :  { %2025 = vmatprep.subr.bf16.mxu0 %v2323_v6 }
  0x12   :  { %2056 = vmatmul.mubr.msk.bf16.gmra.mxu1 %vm274_vm0, %v2323_v6 }
  0x13   :  { %2026 = vmatpush3.bf16.msra.mxu0 %v2323_v6  ;;  %2059 = vmatprep.mubr.msk.bf16.mxu1 %vm274_vm0, %v2322_v3 }
  0x14   :  { %2027 = vmatprep.subr.bf16.mxu0 %v2324_v7 }
  0x17   :  { %2028 = vmatpush3.bf16.msra.mxu0 %v2324_v7 }
  0x18   :  { %2029 = vmatprep.subr.bf16.mxu0 %v2325_v11 }
  0x1a   :  { %2060 = vmatmul.mubr.msk.bf16.gmra.mxu1 %vm274_vm0, %v2321_v2 }
  0x1b   :  { %2030 = vmatpush3.bf16.msra.mxu0 %v2325_v11  ;;  %2063 = vmatprep.mubr.msk.bf16.mxu1 %vm274_vm0, %v2320_v1 }
  0x1c   :  { %2031 = vmatprep.subr.bf16.mxu0 %v2326_v4 }
  0x1f   :  { %2032 = vmatpush3.bf16.msra.mxu0 %v2326_v4 }
  0x22   :  { %2034 = vmatmul.mubr.bf16.vlgmr.msra.gmra.mxu0 %v2550_v13  ;;  %2064 = vmatmul.mubr.msk.bf16.gmra.mxu1 %vm274_vm0, %v2319_v0 }
  0x23   :  { %2037 = vmatprep.mubr.bf16.mxu0 %v2556_v14 }
  0x2a   :  { %2038 = vmatmul.mubr.bf16.gmra.mxu0 %v2564_v15 }
  0x2b   :  { %2041 = vmatprep.mubr.bf16.mxu0 %v2570_v16 }
  0x32   :  { %2042 = vmatmul.mubr.bf16.gmra.mxu0 %v2578_v17 }
  0x33   :  { %2045 = vmatprep.mubr.bf16.mxu0 %v2583_v18 }
  0x3a   :  { %2046 = vmatmul.mubr.bf16.gmra.mxu0 %v2590_v19 }
  0x3b   :  { %2101 = vmatprep.mubr.bf16.mxu0 %v2525_v5 }
  0xca   :  { %v2603_v44 = vpop.f32.mrf.mxu1 }
  0xcc   :  { %v2605_v45 = vpop.f32.mrf.mxu1 }
  0xce   :  { %v2607_v46 = vpop.f32.mrf.mxu1 }
  0xd0   :  { %v2609_v47 = vpop.f32.mrf.mxu1 }
  0xd2   :  { %v2057_v48 = vpop.f32.mrf.mxu1 }
  0xd4   :  { %v353_v49 = vpop.f32.mrf.mxu1 }
  0xd6   :  { %v2058_v50 = vpop.f32.mrf.mxu1 }
  0xd8   :  { %v356_v51 = vpop.f32.mrf.mxu1 }
  0xda   :  { %v2061_v52 = vpop.f32.mrf.mxu1 }
  0xdc   :  { %v369_v53 = vpop.f32.mrf.mxu1 }
  0xde   :  { %v2062_v54 = vpop.f32.mrf.mxu1 }
  0xe0   :  { %v372_v55 = vpop.f32.mrf.mxu1 }
  0xe2   :  { %v2035_v20 = vpop.f32.mrf.mxu0  ;;  %v2065_v56 = vpop.f32.mrf.mxu1 }
  0xe4   :  { %v201_v21 = vpop.f32.mrf.mxu0  ;;  %v385_v57 = vpop.f32.mrf.mxu1 }
  0xe6   :  { %v2036_v22 = vpop.f32.mrf.mxu0  ;;  %v2066_v58 = vpop.f32.mrf.mxu1 }
  0xe7   :  { %v265_v25 = vpack.c.bf16 %v2036_v22, %v2035_v20 }
  0xe8   :  { %v204_v23 = vpop.f32.mrf.mxu0  ;;  %v388_v59 = vpop.f32.mrf.mxu1 }
  0xe9   :  { %v264_v24 = vpack.c.bf16 %v204_v23, %v201_v21 }
  0xea   :  { %v2039_v26 = vpop.f32.mrf.mxu0 }
  0xeb   :  { %2069 = vmatprep.mubr.msk.bf16.mxu1 %vm274_vm0, %v264_v24 }
  0xec   :  { %v217_v27 = vpop.f32.mrf.mxu0  ;;  %2070 = vmatmul.mubr.msk.bf16.vlgmr.msra.gmra.mxu1 %vm274_vm0, %v265_v25 }
  0xee   :  { %v2040_v28 = vpop.f32.mrf.mxu0 }
  0xef   :  { %v267_v31 = vpack.c.bf16 %v2040_v28, %v2039_v26 }
  0xf0   :  { %v220_v29 = vpop.f32.mrf.mxu0 }
  0xf1   :  { %v266_v30 = vpack.c.bf16 %v220_v29, %v217_v27 }
  0xf2   :  { %v2043_v32 = vpop.f32.mrf.mxu0 }
  0xf3   :  { %2073 = vmatprep.mubr.msk.bf16.mxu1 %vm274_vm0, %v266_v30 }
  0xf4   :  { %v233_v33 = vpop.f32.mrf.mxu0  ;;  %2074 = vmatmul.mubr.msk.bf16.gmra.mxu1 %vm274_vm0, %v267_v31 }
  0xf6   :  { %v2044_v34 = vpop.f32.mrf.mxu0 }
  0xf7   :  { %v269_v37 = vpack.c.bf16 %v2044_v34, %v2043_v32 }
  0xf8   :  { %v236_v35 = vpop.f32.mrf.mxu0 }
  0xf9   :  { %v268_v36 = vpack.c.bf16 %v236_v35, %v233_v33 }
  0xfa   :  { %v2047_v38 = vpop.f32.mrf.mxu0 }
  0xfb   :  { %2077 = vmatprep.mubr.msk.bf16.mxu1 %vm274_vm0, %v268_v36 }
  0xfc   :  { %v249_v39 = vpop.f32.mrf.mxu0  ;;  %2078 = vmatmul.mubr.msk.bf16.gmra.mxu1 %vm274_vm0, %v269_v37 }
  0xfe   :  { %v2048_v40 = vpop.f32.mrf.mxu0 }
  0xff   :  { %v271_v43 = vpack.c.bf16 %v2048_v40, %v2047_v38 }
 0x100   :  { %v252_v41 = vpop.f32.mrf.mxu0 }
 0x101   :  { %v270_v42 = vpack.c.bf16 %v252_v41, %v249_v39 }
 0x103   :  { %2081 = vmatprep.mubr.msk.bf16.mxu1 %vm274_vm0, %v270_v42 }
 0x104   :  { %2082 = vmatmul.mubr.msk.bf16.gmra.mxu1 %vm274_vm0, %v271_v43 }
 0x105   :  { %2113 = vmatprep.mubr.bf16.mxu1 %v2583_v18 }
 0x1ac   :  { %v2071_v60 = vpop.f32.mrf.mxu1 }
 0x1ae   :  { %v2611_v61 = vpop.f32.mrf.mxu1 }
 0x1b0   :  { %v2072_v62 = vpop.f32.mrf.mxu1 }
 0x1b2   :  { %v464_v63 = vpop.f32.mrf.mxu1 }
 0x1b4   :  { %v2075_v0 = vpop.f32.mrf.mxu1 }
 0x1b5   :  { %v486_v37 = vadd.f32 %v2075_v0, %v2057_v48  ;;  %v470_v48 = vadd.f32 %v2071_v60, %v2603_v44 }
 0x1b6   :  { %v477_v1 = vpop.f32.mrf.mxu1 }
 0x1b7   :  { %v537_v41 = vadd.f32 %v2616_v12, %v486_v37  ;;  %v478_v42 = vadd.f32 %v477_v1, %v353_v49  ;;  %v465_v49 = vadd.f32 %v464_v63, %v2609_v47  ;;  %v533_v44 = vadd.f32 %v2616_v12, %v470_v48 }
 0x1b8   :  { %v2076_v2 = vpop.f32.mrf.mxu1 }
 0x1b9   :  { %v489_v35 = vadd.f32 %v2076_v2, %v2058_v50  ;;  %v532_v60 = vadd.f32 %v2616_v12, %v465_v49 }
 0x1ba   :  { %v480_v3 = vpop.f32.mrf.mxu1 }
 0x1bb   :  { %v538_v39 = vadd.f32 %v2616_v12, %v489_v35  ;;  %v481_v40 = vadd.f32 %v480_v3, %v356_v51 }
 0x1bc   :  { %v2079_v4 = vpop.f32.mrf.mxu1 }
 0x1bd   :  { %v502_v27 = vadd.f32 %v2079_v4, %v2061_v52  ;;  %v473_v52 = vadd.f32 %v2072_v62, %v2607_v46  ;;  %v536_v50 = vadd.f32 %v2616_v12, %v481_v40 }
 0x1be   :  { %v493_v6 = vpop.f32.mrf.mxu1 }
 0x1bf   :  { %v541_v33 = vadd.f32 %v2616_v12, %v502_v27  ;;  %v494_v34 = vadd.f32 %v493_v6, %v369_v53 }
 0x1c0   :  { %v2080_v7 = vpop.f32.mrf.mxu1 }
 0x1c1   :  { %v505_v23 = vadd.f32 %v2080_v7, %v2062_v54  ;;  %v539_v38 = vadd.f32 %v2616_v12, %v494_v34 }
 0x1c2   :  { %v496_v8 = vpop.f32.mrf.mxu1 }
 0x1c3   :  { %v542_v30 = vadd.f32 %v2616_v12, %v505_v23  ;;  %v497_v31 = vadd.f32 %v496_v8, %v372_v55  ;;  %v535_v55 = vadd.f32 %v2616_v12, %v478_v42  ;;  %v2336_v23 = vld [vmem:[%s2908_s6] sm:$0xff]  }
 0x1c4   :  { %v2083_v9 = vpop.f32.mrf.mxu1 }
 0x1c5   :  { %v518_v10 = vadd.f32 %v2083_v9, %v2065_v56  ;;  %v540_v36 = vadd.f32 %v2616_v12, %v497_v31 }
 0x1c6   :  { %v509_v11 = vpop.f32.mrf.mxu1 }
 0x1c7   :  { %v510_v20 = vadd.f32 %v509_v11, %v385_v57  ;;  %v545_v21 = vadd.f32 %v2616_v12, %v518_v10  ;;  %v534_v57 = vadd.f32 %v2616_v12, %v473_v52 }
 0x1c8   :  { %v2084_v22 = vpop.f32.mrf.mxu1 }
 0x1c9   :  { %v521_v24 = vadd.f32 %v2084_v22, %v2066_v58  ;;  %v543_v25 = vadd.f32 %v2616_v12, %v510_v20  ;;  %2343 = vtanh.f32 %v545_v21  ;;  %v2335_v21 = vld [vmem:[%s2908_s6 + $0x8] sm:$0xff]  }
 0x1ca   :  { %v512_v26 = vpop.f32.mrf.mxu1  ;;  %v2663_v22 = vld [vmem:[%s2909_s5 + $0x8] sm:$0xff]  }
 0x1cb   :  { %v546_v28 = vadd.f32 %v2616_v12, %v521_v24  ;;  %v513_v29 = vadd.f32 %v512_v26, %v388_v59  ;;  %v462_v59 = vadd.f32 %v2611_v61, %v2605_v45  ;;  %v2674_v24 = vld [vmem:[%s2909_s5] sm:$0xff]  }
 0x1cd   :  { %2345 = vtanh.f32 %v546_v28  ;;  %v544_v32 = vadd.f32 %v2616_v12, %v513_v29  ;;  %v531_v0 = vadd.f32 %v2616_v12, %v462_v59 }
 0x1ce   :  { %2347 = vtanh.f32 %v543_v25 }
 0x1cf   :  { %2349 = vtanh.f32 %v544_v32 }
 0x1d0   :  { %2351 = vtanh.f32 %v542_v30 }
 0x1d1   :  { %2353 = vtanh.f32 %v541_v33 }
 0x1d2   :  { %2355 = vtanh.f32 %v540_v36 }
 0x1d3   :  { %2357 = vtanh.f32 %v539_v38 }
 0x1d4   :  { %2359 = vtanh.f32 %v538_v39 }
 0x1d5   :  { %2361 = vtanh.f32 %v537_v41 }
 0x1d6   :  { %v2344_v43 = vpop.eup %2343  ;;  %2363 = vtanh.f32 %v536_v50 }
 0x1d7   :  { %2365 = vtanh.f32 %v535_v55 }
 0x1d8   :  { %2367 = vtanh.f32 %v534_v57 }
 0x1d9   :  { %2369 = vtanh.f32 %v533_v44 }
 0x1da   :  { %v2346_v53 = vpop.eup %2345  ;;  %2371 = vtanh.f32 %v532_v60 }
 0x1db   :  { %v2348_v54 = vpop.eup %2347  ;;  %v2632_v56 = vpack.c.bf16 %v2346_v53, %v2344_v43  ;;  %2373 = vtanh.f32 %v531_v0 }
 0x1dc   :  { %v2350_v51 = vpop.eup %2349 }
 0x1dd   :  { %2085 = vmatprep.subr.bf16.mxu0 %v2632_v56  ;;  %2301 = vmatprep.subr.bf16.mxu1 %v2632_v56  ;;  %v2638_v46 = vpack.c.bf16 %v2350_v51, %v2348_v54  ;;  %v2352_v58 = vpop.eup %2351 }
 0x1de   :  { %2086 = vmatpush3.bf16.msra.mxu0 %v2632_v56  ;;  %2309 = vmatpush3.bf16.msra.mxu1 %v2632_v56  ;;  %v2354_v47 = vpop.eup %2353 }
 0x1df   :  { %2087 = vmatprep.subr.bf16.mxu0 %v2638_v46  ;;  %2302 = vmatprep.subr.bf16.mxu1 %v2638_v46  ;;  %v2648_v62 = vpack.c.bf16 %v2352_v58, %v2354_v47  ;;  %v2356_v63 = vpop.eup %2355 }
 0x1e0   :  { %v2358_v45 = vpop.eup %2357 }
 0x1e1   :  { %v567_v61 = vpack.c.bf16 %v2356_v63, %v2358_v45  ;;  %v2360_v1 = vpop.eup %2359 }
 0x1e2   :  { %2088 = vmatpush3.bf16.msra.mxu0 %v2638_v46  ;;  %2310 = vmatpush3.bf16.msra.mxu1 %v2638_v46  ;;  %v2362_v2 = vpop.eup %2361 }
 0x1e3   :  { %2089 = vmatprep.subr.bf16.mxu0 %v2648_v62  ;;  %2303 = vmatprep.subr.bf16.mxu1 %v2648_v62  ;;  %v566_v3 = vpack.c.bf16 %v2360_v1, %v2362_v2  ;;  %v2364_v4 = vpop.eup %2363 }
 0x1e4   :  { %v2366_v6 = vpop.eup %2365 }
 0x1e5   :  { %v565_v7 = vpack.c.bf16 %v2364_v4, %v2366_v6  ;;  %v2368_v8 = vpop.eup %2367 }
 0x1e6   :  { %2090 = vmatpush3.bf16.msra.mxu0 %v2648_v62  ;;  %2311 = vmatpush3.bf16.msra.mxu1 %v2648_v62  ;;  %v2370_v9 = vpop.eup %2369 }
 0x1e7   :  { %2091 = vmatprep.subr.bf16.mxu0 %v567_v61  ;;  %2304 = vmatprep.subr.bf16.mxu1 %v567_v61  ;;  %v564_v10 = vpack.c.bf16 %v2368_v8, %v2370_v9  ;;  %v2372_v11 = vpop.eup %2371 }
 0x1e8   :  { %v2374_v12 = vpop.eup %2373 }
 0x1e9   :  { %v563_v20 = vpack.c.bf16 %v2372_v11, %v2374_v12 }
 0x1ea   :  { %2092 = vmatpush3.bf16.msra.mxu0 %v567_v61  ;;  %2312 = vmatpush3.bf16.msra.mxu1 %v567_v61 }
 0x1eb   :  { %2093 = vmatprep.subr.bf16.mxu0 %v566_v3  ;;  %2305 = vmatprep.subr.bf16.mxu1 %v566_v3 }
 0x1ee   :  { %2094 = vmatpush3.bf16.msra.mxu0 %v566_v3  ;;  %2313 = vmatpush3.bf16.msra.mxu1 %v566_v3 }
 0x1ef   :  { %2095 = vmatprep.subr.bf16.mxu0 %v565_v7  ;;  %2306 = vmatprep.subr.bf16.mxu1 %v565_v7 }
 0x1f2   :  { %2096 = vmatpush3.bf16.msra.mxu0 %v565_v7  ;;  %2314 = vmatpush3.bf16.msra.mxu1 %v565_v7 }
 0x1f3   :  { %2097 = vmatprep.subr.bf16.mxu0 %v564_v10  ;;  %2307 = vmatprep.subr.bf16.mxu1 %v564_v10 }
 0x1f6   :  { %2098 = vmatpush3.bf16.msra.mxu0 %v564_v10  ;;  %2315 = vmatpush3.bf16.msra.mxu1 %v564_v10 }
 0x1f7   :  { %2099 = vmatprep.subr.bf16.mxu0 %v563_v20  ;;  %2308 = vmatprep.subr.bf16.mxu1 %v563_v20 }
 0x1fa   :  { %2100 = vmatpush3.bf16.msra.mxu0 %v563_v20  ;;  %2316 = vmatpush3.bf16.msra.mxu1 %v563_v20 }
 0x1fb   :  { %2117 = vmatprep.subr.bf16.mxu1 %v2335_v21  ;;  %2137 = vmatprep.subr.bf16.mxu0 %v2663_v22 }
 0x1fd   :  { %2102 = vmatmul.mubr.bf16.vlgmr.msra.gmra.mxu0 %v2550_v13  ;;  %2114 = vmatmul.mubr.bf16.vlgmr.msra.gmra.mxu1 %v2590_v19 }
 0x1fe   :  { %2118 = vmatpush3.bf16.msra.mxu1 %v2335_v21  ;;  %2121 = vmatprep.mubr.msk.bf16.mxu1 %vm703_vm2, %v563_v20 }
 0x1ff   :  { %2119 = vmatprep.subr.bf16.mxu1 %v2336_v23  ;;  %2105 = vmatprep.mubr.bf16.mxu0 %v2556_v14 }
 0x200   :  { %2138 = vmatpush3.bf16.msra.mxu0 %v2663_v22 }
 0x201   :  { %2139 = vmatprep.subr.bf16.mxu0 %v2674_v24 }
 0x202   :  { %2120 = vmatpush3.bf16.msra.mxu1 %v2336_v23 }
 0x204   :  { %2140 = vmatpush3.bf16.msra.mxu0 %v2674_v24 }
 0x205   :  { %2106 = vmatmul.mubr.bf16.gmra.mxu0 %v2564_v15  ;;  %2122 = vmatmul.mubr.msk.bf16.vlgmr.msra.gmra.mxu1 %vm703_vm2, %v564_v10 }
 0x206   :  { %2125 = vmatprep.mubr.msk.bf16.mxu1 %vm703_vm2, %v565_v7  ;;  %2109 = vmatprep.mubr.bf16.mxu0 %v2570_v16 }
 0x207   :  { %2189 = vmatprep.subr.bf16.mxu0 %v2335_v21 }
 0x20d   :  { %2110 = vmatmul.mubr.bf16.gmra.mxu0 %v2578_v17  ;;  %2126 = vmatmul.mubr.msk.bf16.gmra.mxu1 %vm703_vm2, %v566_v3 }
 0x20e   :  { %2129 = vmatprep.mubr.msk.bf16.mxu1 %vm703_vm2, %v567_v61 }
 0x215   :  { %2130 = vmatmul.mubr.msk.bf16.gmra.mxu1 %vm703_vm2, %v2648_v62  ;;  %v2706_v62 = vld [vmem:[%s2911_s7] ss:$0 sm:$0xff] }
 0x216   :  { %2133 = vmatprep.mubr.msk.bf16.mxu1 %vm703_vm2, %v2638_v46 }
 0x21d   :  { %2134 = vmatmul.mubr.msk.bf16.gmra.mxu1 %vm703_vm2, %v2632_v56 }
 0x21e   :  { %2173 = vmatprep.mubr.bf16.mxu1 %v2525_v5 }
 0x2bd   :  { %v2103_v25 = vpop.f32.mrf.mxu0  ;;  %v2115_v32 = vpop.f32.mrf.mxu1 }
 0x2bf   :  { %v620_v26 = vpop.f32.mrf.mxu0  ;;  %v668_v35 = vpop.f32.mrf.mxu1 }
 0x2c1   :  { %v2104_v27 = vpop.f32.mrf.mxu0  ;;  %v2116_v39 = vpop.f32.mrf.mxu1 }
 0x2c2   :  { %v684_v30 = vpack.c.bf16 %v2104_v27, %v2103_v25  ;;  %v690_v54 = vpack.c.bf16 %v2116_v39, %v2115_v32 }
 0x2c3   :  { %v623_v28 = vpop.f32.mrf.mxu0  ;;  %v671_v42 = vpop.f32.mrf.mxu1 }
 0x2c4   :  { %v683_v29 = vpack.c.bf16 %v623_v28, %v620_v26  ;;  %v689_v52 = vpack.c.bf16 %v671_v42, %v668_v35 }
 0x2c5   :  { %v2107_v31 = vpop.f32.mrf.mxu0  ;;  %v2123_v48 = vpop.f32.mrf.mxu1 }
 0x2c6   :  { %2141 = vmatprep.mubr.msk.bf16.mxu0 %vm703_vm2, %v683_v29 }
 0x2c7   :  { %v636_v33 = vpop.f32.mrf.mxu0  ;;  %2142 = vmatmul.mubr.msk.bf16.vlgmr.msra.gmra.mxu0 %vm703_vm2, %v684_v30  ;;  %v762_v55 = vpop.f32.mrf.mxu1 }
 0x2c8   :  { %2190 = vmatpush3.bf16.msra.mxu0 %v2335_v21 }
 0x2c9   :  { %v2108_v34 = vpop.f32.mrf.mxu0  ;;  %2191 = vmatprep.subr.bf16.mxu0 %v2336_v23  ;;  %v2124_v56 = vpop.f32.mrf.mxu1 }
 0x2ca   :  { %v686_v5 = vpack.c.bf16 %v2108_v34, %v2107_v31 }
 0x2cb   :  { %v639_v36 = vpop.f32.mrf.mxu0  ;;  %v765_v51 = vpop.f32.mrf.mxu1 }
 0x2cc   :  { %v685_v37 = vpack.c.bf16 %v639_v36, %v636_v33  ;;  %2192 = vmatpush3.bf16.msra.mxu0 %v2336_v23 }
 0x2cd   :  { %v2111_v38 = vpop.f32.mrf.mxu0  ;;  %v2127_v57 = vpop.f32.mrf.mxu1 }
 0x2ce   :  { %2145 = vmatprep.mubr.msk.bf16.mxu0 %vm703_vm2, %v685_v37 }
 0x2cf   :  { %v652_v40 = vpop.f32.mrf.mxu0  ;;  %2146 = vmatmul.mubr.msk.bf16.gmra.mxu0 %vm703_vm2, %v686_v5  ;;  %v778_v49 = vpop.f32.mrf.mxu1 }
 0x2d1   :  { %v2112_v41 = vpop.f32.mrf.mxu0  ;;  %v2128_v46 = vpop.f32.mrf.mxu1 }
 0x2d2   :  { %v688_v53 = vpack.c.bf16 %v2112_v41, %v2111_v38 }
 0x2d3   :  { %v655_v43 = vpop.f32.mrf.mxu0  ;;  %v781_v58 = vpop.f32.mrf.mxu1 }
 0x2d4   :  { %v687_v50 = vpack.c.bf16 %v655_v43, %v652_v40 }
 0x2d5   :  { %v2131_v59 = vpop.f32.mrf.mxu1 }
 0x2d6   :  { %2149 = vmatprep.mubr.msk.bf16.mxu0 %vm703_vm2, %v687_v50 }
 0x2d7   :  { %2150 = vmatmul.mubr.msk.bf16.gmra.mxu0 %vm703_vm2, %v688_v53  ;;  %v794_v1 = vpop.f32.mrf.mxu1 }
 0x2d8   :  { %2153 = vmatprep.mubr.msk.bf16.mxu0 %vm703_vm2, %v689_v52 }
 0x2d9   :  { %v2132_v9 = vpop.f32.mrf.mxu1 }
 0x2db   :  { %v797_v25 = vpop.f32.mrf.mxu1 }
 0x2dd   :  { %v2135_v32 = vpop.f32.mrf.mxu1 }
 0x2df   :  { %2154 = vmatmul.mubr.msk.bf16.gmra.mxu0 %vm703_vm2, %v690_v54  ;;  %v810_v39 = vpop.f32.mrf.mxu1 }
 0x387   :  { %v2143_v44 = vpop.f32.mrf.mxu0 }
 0x388   :  { %v904_v63 = vadd.f32 %v2143_v44, %v2123_v48 }
 0x389   :  { %v895_v47 = vpop.f32.mrf.mxu0 }
 0x38a   :  { %v896_v60 = vadd.f32 %v895_v47, %v762_v55  ;;  %v960_v6 = vadd.f32 %v2706_v62, %v904_v63 }
 0x38b   :  { %v2144_v0 = vpop.f32.mrf.mxu0 }
 0x38c   :  { %v958_v45 = vadd.f32 %v2706_v62, %v896_v60  ;;  %v907_v61 = vadd.f32 %v2144_v0, %v2124_v56 }
 0x38d   :  { %v898_v2 = vpop.f32.mrf.mxu0 }
 0x38e   :  { %v961_v3 = vadd.f32 %v2706_v62, %v907_v61  ;;  %v899_v4 = vadd.f32 %v898_v2, %v765_v51  ;;  %2375 = vtanh.f32 %v958_v45  ;;  %v2136_v51 = vpop.f32.mrf.mxu1 }
 0x38f   :  { %v2147_v7 = vpop.f32.mrf.mxu0 }
 0x390   :  { %v959_v8 = vadd.f32 %v2706_v62, %v899_v4  ;;  %2377 = vtanh.f32 %v961_v3  ;;  %v920_v12 = vadd.f32 %v2147_v7, %v2127_v57  ;;  %v813_v60 = vpop.f32.mrf.mxu1 }
 0x391   :  { %v911_v10 = vpop.f32.mrf.mxu0 }
 0x392   :  { %2379 = vtanh.f32 %v959_v8  ;;  %v912_v11 = vadd.f32 %v911_v10, %v778_v49  ;;  %v964_v29 = vadd.f32 %v2706_v62, %v920_v12 }
 0x393   :  { %2381 = vtanh.f32 %v960_v6  ;;  %v2148_v20 = vpop.f32.mrf.mxu0 }
 0x394   :  { %v962_v21 = vadd.f32 %v2706_v62, %v912_v11  ;;  %v923_v23 = vadd.f32 %v2148_v20, %v2128_v46 }
 0x395   :  { %v914_v26 = vpop.f32.mrf.mxu0 }
 0x396   :  { %v965_v27 = vadd.f32 %v2706_v62, %v923_v23  ;;  %v915_v28 = vadd.f32 %v914_v26, %v781_v58  ;;  %2383 = vtanh.f32 %v962_v21 }
 0x397   :  { %v2151_v30 = vpop.f32.mrf.mxu0 }
 0x398   :  { %v963_v31 = vadd.f32 %v2706_v62, %v915_v28  ;;  %2385 = vtanh.f32 %v965_v27  ;;  %v936_v35 = vadd.f32 %v2151_v30, %v2131_v59 }
 0x399   :  { %v927_v33 = vpop.f32.mrf.mxu0 }
 0x39a   :  { %2387 = vtanh.f32 %v963_v31  ;;  %v928_v34 = vadd.f32 %v927_v33, %v794_v1  ;;  %v968_v50 = vadd.f32 %v2706_v62, %v936_v35 }
 0x39b   :  { %2389 = vtanh.f32 %v964_v29  ;;  %v2152_v36 = vpop.f32.mrf.mxu0  ;;  %v2376_v38 = vpop.eup %2375 }
 0x39c   :  { %v966_v37 = vadd.f32 %v2706_v62, %v928_v34  ;;  %v939_v5 = vadd.f32 %v2152_v36, %v2132_v9 }
 0x39d   :  { %v930_v40 = vpop.f32.mrf.mxu0  ;;  %v2378_v41 = vpop.eup %2377 }
 0x39e   :  { %v969_v42 = vadd.f32 %v2706_v62, %v939_v5  ;;  %v931_v43 = vadd.f32 %v930_v40, %v797_v25  ;;  %2391 = vtanh.f32 %v966_v37 }
 0x39f   :  { %v2380_v52 = vpop.eup %2379  ;;  %v2155_v53 = vpop.f32.mrf.mxu0 }
 0x3a0   :  { %v2382_v54 = vpop.eup %2381  ;;  %v967_v48 = vadd.f32 %v2706_v62, %v931_v43  ;;  %v952_v55 = vadd.f32 %v2155_v53, %v2135_v32  ;;  %v990_v56 = vpack.c.bf16 %v2380_v52, %v2376_v38  ;;  %2393 = vtanh.f32 %v969_v42  ;;  %v2341_v52 = vld [vmem:[%s2913_s9 + $0x8] sm:$0xff]   ;;  %v2342_v53 = vld [vmem:[%s2913_s9] sm:$0xff]  }
 0x3a1   :  { %v991_v57 = vpack.c.bf16 %v2378_v41, %v2382_v54  ;;  %v943_v49 = vpop.f32.mrf.mxu0 }
 0x3a2   :  { %2395 = vtanh.f32 %v967_v48  ;;  %v944_v46 = vadd.f32 %v943_v49, %v810_v39  ;;  %2193 = vmatprep.mubr.msk.bf16.mxu0 %vm703_vm2, %v990_v56  ;;  %v972_v58 = vadd.f32 %v2706_v62, %v952_v55 }
 0x3a3   :  { %2397 = vtanh.f32 %v968_v50  ;;  %v2156_v44 = vpop.f32.mrf.mxu0  ;;  %2194 = vmatmul.mubr.msk.bf16.vlgmr.msra.gmra.mxu0 %vm703_vm2, %v991_v57  ;;  %v2384_v47 = vpop.eup %2383  ;;  %v2340_v50 = vld [vmem:[%s2912_s8] sm:$0xff]  }
 0x3a4   :  { %v955_v59 = vadd.f32 %v2156_v44, %v2136_v51  ;;  %v970_v63 = vadd.f32 %v2706_v62, %v944_v46  ;;  %2399 = vtanh.f32 %v972_v58 }
 0x3a5   :  { %v946_v0 = vpop.f32.mrf.mxu0  ;;  %v2386_v45 = vpop.eup %2385 }
 0x3a6   :  { %v973_v61 = vadd.f32 %v2706_v62, %v955_v59  ;;  %v947_v1 = vadd.f32 %v946_v0, %v813_v60 }
 0x3a7   :  { %v2388_v2 = vpop.eup %2387 }
 0x3a8   :  { %v2390_v3 = vpop.eup %2389  ;;  %2401 = vtanh.f32 %v973_v61  ;;  %v971_v4 = vadd.f32 %v2706_v62, %v947_v1  ;;  %v992_v6 = vpack.c.bf16 %v2388_v2, %v2384_v47 }
 0x3a9   :  { %2403 = vtanh.f32 %v970_v63  ;;  %v993_v7 = vpack.c.bf16 %v2386_v45, %v2390_v3 }
 0x3aa   :  { %2405 = vtanh.f32 %v971_v4  ;;  %2197 = vmatprep.mubr.msk.bf16.mxu0 %vm703_vm2, %v992_v6 }
 0x3ab   :  { %2198 = vmatmul.mubr.msk.bf16.gmra.mxu0 %vm703_vm2, %v993_v7  ;;  %v2392_v8 = vpop.eup %2391 }
 0x3ad   :  { %v2394_v9 = vpop.eup %2393 }
 0x3af   :  { %v2396_v10 = vpop.eup %2395 }
 0x3b0   :  { %v2398_v11 = vpop.eup %2397  ;;  %v994_v12 = vpack.c.bf16 %v2396_v10, %v2392_v8 }
 0x3b1   :  { %v995_v20 = vpack.c.bf16 %v2394_v9, %v2398_v11  ;;  %v2400_v21 = vpop.eup %2399 }
 0x3b2   :  { %2201 = vmatprep.mubr.msk.bf16.mxu0 %vm703_vm2, %v994_v12 }
 0x3b3   :  { %2202 = vmatmul.mubr.msk.bf16.gmra.mxu0 %vm703_vm2, %v995_v20 }
 0x3b5   :  { %v2402_v23 = vpop.eup %2401 }
 0x3b6   :  { %v2404_v25 = vpop.eup %2403  ;;  %v997_v26 = vpack.c.bf16 %v2402_v23, %v2400_v21 }
 0x3b7   :  { %v2406_v27 = vpop.eup %2405 }
 0x3b8   :  { %2157 = vmatprep.subr.bf16.mxu1 %v997_v26  ;;  %v996_v28 = vpack.c.bf16 %v2406_v27, %v2404_v25 }
 0x3b9   :  { %2158 = vmatpush3.bf16.msra.mxu1 %v997_v26 }
 0x3ba   :  { %2159 = vmatprep.subr.bf16.mxu1 %v996_v28  ;;  %2205 = vmatprep.mubr.msk.bf16.mxu0 %vm703_vm2, %v996_v28 }
 0x3bb   :  { %2206 = vmatmul.mubr.msk.bf16.gmra.mxu0 %vm703_vm2, %v997_v26 }
 0x3bd   :  { %2160 = vmatpush3.bf16.msra.mxu1 %v996_v28 }
 0x3be   :  { %2161 = vmatprep.subr.bf16.mxu1 %v995_v20 }
 0x3c1   :  { %2162 = vmatpush3.bf16.msra.mxu1 %v995_v20 }
 0x3c2   :  { %2163 = vmatprep.subr.bf16.mxu1 %v994_v12 }
 0x3c5   :  { %2164 = vmatpush3.bf16.msra.mxu1 %v994_v12 }
 0x3c6   :  { %2165 = vmatprep.subr.bf16.mxu1 %v993_v7 }
 0x3c9   :  { %2166 = vmatpush3.bf16.msra.mxu1 %v993_v7 }
 0x3ca   :  { %2167 = vmatprep.subr.bf16.mxu1 %v992_v6 }
 0x3cd   :  { %2168 = vmatpush3.bf16.msra.mxu1 %v992_v6 }
 0x3ce   :  { %2169 = vmatprep.subr.bf16.mxu1 %v991_v57 }
 0x3d1   :  { %2170 = vmatpush3.bf16.msra.mxu1 %v991_v57 }
 0x3d2   :  { %2171 = vmatprep.subr.bf16.mxu1 %v990_v56 }
 0x3d5   :  { %2172 = vmatpush3.bf16.msra.mxu1 %v990_v56 }
 0x3d6   :  { %2209 = vmatprep.subr.bf16.mxu1 %v2663_v22 }
 0x3d8   :  { %2174 = vmatmul.mubr.bf16.vlgmr.msra.gmra.mxu1 %v2550_v13  ;;  %v2339_v13 = vld [vmem:[%s2912_s8 + $0x8] sm:$0xff]  }
 0x3d9   :  { %2177 = vmatprep.mubr.bf16.mxu1 %v2556_v14  ;;  %2210 = vmatpush3.bf16.msra.mxu1 %v2663_v22 }
 0x3da   :  { %2211 = vmatprep.subr.bf16.mxu1 %v2674_v24  ;;  %2229 = vmatprep.subr.bf16.mxu0 %v2339_v13 }
 0x3db   :  { %2230 = vmatpush3.bf16.msra.mxu0 %v2339_v13 }
 0x3dc   :  { %2231 = vmatprep.subr.bf16.mxu0 %v2340_v50 }
 0x3dd   :  { %2212 = vmatpush3.bf16.msra.mxu1 %v2674_v24 }
 0x3de   :  { %2249 = vmatprep.subr.bf16.mxu1 %v2341_v52 }
 0x3df   :  { %2232 = vmatpush3.bf16.msra.mxu0 %v2340_v50 }
 0x3e0   :  { %2178 = vmatmul.mubr.bf16.gmra.mxu1 %v2564_v15 }
 0x3e1   :  { %2181 = vmatprep.mubr.bf16.mxu1 %v2570_v16 }
 0x3e8   :  { %2182 = vmatmul.mubr.bf16.gmra.mxu1 %v2578_v17 }
 0x3e9   :  { %2185 = vmatprep.mubr.bf16.mxu1 %v2583_v18 }
 0x3f0   :  { %2186 = vmatmul.mubr.bf16.gmra.mxu1 %v2590_v19 }
 0x463   :  { %v2195_v54 = vpop.f32.mrf.mxu0 }
 0x465   :  { %v1161_v48 = vpop.f32.mrf.mxu0 }
 0x467   :  { %v2196_v55 = vpop.f32.mrf.mxu0 }
 0x469   :  { %v1164_v56 = vpop.f32.mrf.mxu0 }
 0x46b   :  { %v2199_v51 = vpop.f32.mrf.mxu0 }
 0x46d   :  { %v1177_v57 = vpop.f32.mrf.mxu0 }
 0x46f   :  { %v2200_v49 = vpop.f32.mrf.mxu0 }
 0x471   :  { %v1180_v46 = vpop.f32.mrf.mxu0 }
 0x473   :  { %v2203_v44 = vpop.f32.mrf.mxu0 }
 0x475   :  { %v1193_v61 = vpop.f32.mrf.mxu0 }
 0x477   :  { %v2204_v8 = vpop.f32.mrf.mxu0 }
 0x479   :  { %v1196_v23 = vpop.f32.mrf.mxu0 }
 0x498   :  { %v2175_v14 = vpop.f32.mrf.mxu1 }
 0x49a   :  { %v1032_v22 = vpop.f32.mrf.mxu1 }
 0x49c   :  { %v2176_v29 = vpop.f32.mrf.mxu1 }
 0x49d   :  { %v1096_v15 = vpack.c.bf16 %v2176_v29, %v2175_v14 }
 0x49e   :  { %v1035_v24 = vpop.f32.mrf.mxu1 }
 0x49f   :  { %v1095_v30 = vpack.c.bf16 %v1035_v24, %v1032_v22  ;;  %v2207_v22 = vpop.f32.mrf.mxu0 }
 0x4a0   :  { %v2179_v31 = vpop.f32.mrf.mxu1 }
 0x4a1   :  { %2213 = vmatprep.mubr.msk.bf16.mxu1 %vm703_vm2, %v1095_v30 }
 0x4a2   :  { %v1048_v16 = vpop.f32.mrf.mxu1  ;;  %2214 = vmatmul.mubr.msk.bf16.vlgmr.msra.gmra.mxu1 %vm703_vm2, %v1096_v15 }
 0x4a3   :  { %2250 = vmatpush3.bf16.msra.mxu1 %v2341_v52 }
 0x4a4   :  { %v2180_v17 = vpop.f32.mrf.mxu1  ;;  %2251 = vmatprep.subr.bf16.mxu1 %v2342_v53 }
 0x4a5   :  { %v1098_v32 = vpack.c.bf16 %v2180_v17, %v2179_v31 }
 0x4a6   :  { %v1051_v18 = vpop.f32.mrf.mxu1 }
 0x4a7   :  { %v1097_v19 = vpack.c.bf16 %v1051_v18, %v1048_v16  ;;  %2252 = vmatpush3.bf16.msra.mxu1 %v2342_v53  ;;  %v1209_v18 = vpop.f32.mrf.mxu0 }
 0x4a8   :  { %v2183_v33 = vpop.f32.mrf.mxu1 }
 0x4a9   :  { %2217 = vmatprep.mubr.msk.bf16.mxu1 %vm703_vm2, %v1097_v19 }
 0x4aa   :  { %v1064_v34 = vpop.f32.mrf.mxu1  ;;  %2218 = vmatmul.mubr.msk.bf16.gmra.mxu1 %vm703_vm2, %v1098_v32 }
 0x4ac   :  { %v2184_v35 = vpop.f32.mrf.mxu1 }
 0x4ad   :  { %v1100_v5 = vpack.c.bf16 %v2184_v35, %v2183_v33 }
 0x4ae   :  { %v1067_v36 = vpop.f32.mrf.mxu1 }
 0x4af   :  { %v1099_v37 = vpack.c.bf16 %v1067_v36, %v1064_v34 }
 0x4b0   :  { %v2187_v38 = vpop.f32.mrf.mxu1 }
 0x4b1   :  { %2221 = vmatprep.mubr.msk.bf16.mxu1 %vm703_vm2, %v1099_v37 }
 0x4b2   :  { %v1080_v39 = vpop.f32.mrf.mxu1  ;;  %2222 = vmatmul.mubr.msk.bf16.gmra.mxu1 %vm703_vm2, %v1100_v5 }
 0x4b4   :  { %v2188_v40 = vpop.f32.mrf.mxu1 }
 0x4b5   :  { %v1102_v43 = vpack.c.bf16 %v2188_v40, %v2187_v38  ;;  %v2208_v40 = vpop.f32.mrf.mxu0 }
 0x4b6   :  { %v1083_v41 = vpop.f32.mrf.mxu1 }
 0x4b7   :  { %v1101_v42 = vpack.c.bf16 %v1083_v41, %v1080_v39 }
 0x4b9   :  { %2225 = vmatprep.mubr.msk.bf16.mxu1 %vm703_vm2, %v1101_v42 }
 0x4ba   :  { %2226 = vmatmul.mubr.msk.bf16.gmra.mxu1 %vm703_vm2, %v1102_v43 }
 0x562   :  { %v2215_v58 = vpop.f32.mrf.mxu1 }
 0x563   :  { %v1291_v60 = vadd.f32 %v2215_v58, %v2195_v54 }
 0x564   :  { %v1282_v59 = vpop.f32.mrf.mxu1 }
 0x565   :  { %v1283_v47 = vadd.f32 %v1282_v59, %v1161_v48  ;;  %v1347_v4 = vadd.f32 %v2706_v62, %v1291_v60 }
 0x566   :  { %v2216_v63 = vpop.f32.mrf.mxu1 }
 0x567   :  { %v1345_v0 = vadd.f32 %v2706_v62, %v1283_v47  ;;  %v1294_v45 = vadd.f32 %v2216_v63, %v2196_v55  ;;  %v1212_v55 = vpop.f32.mrf.mxu0 }
 0x568   :  { %v1285_v1 = vpop.f32.mrf.mxu1 }
 0x569   :  { %v1348_v2 = vadd.f32 %v2706_v62, %v1294_v45  ;;  %v1286_v3 = vadd.f32 %v1285_v1, %v1164_v56  ;;  %2407 = vtanh.f32 %v1345_v0 }
 0x56a   :  { %v2219_v6 = vpop.f32.mrf.mxu1 }
 0x56b   :  { %v1346_v7 = vadd.f32 %v2706_v62, %v1286_v3  ;;  %2409 = vtanh.f32 %v1348_v2  ;;  %v1307_v11 = vadd.f32 %v2219_v6, %v2199_v51 }
 0x56c   :  { %v1298_v9 = vpop.f32.mrf.mxu1 }
 0x56d   :  { %2411 = vtanh.f32 %v1346_v7  ;;  %v1299_v10 = vadd.f32 %v1298_v9, %v1177_v57  ;;  %v1351_v28 = vadd.f32 %v2706_v62, %v1307_v11  ;;  %v2439_v9 = vld [vmem:[%s2905_s0] sm:$0xff]  }
 0x56e   :  { %2413 = vtanh.f32 %v1347_v4  ;;  %v2220_v12 = vpop.f32.mrf.mxu1 }
 0x56f   :  { %v1349_v20 = vadd.f32 %v2706_v62, %v1299_v10  ;;  %v1310_v21 = vadd.f32 %v2220_v12, %v2200_v49 }
 0x570   :  { %v1301_v25 = vpop.f32.mrf.mxu1 }
 0x571   :  { %v1352_v26 = vadd.f32 %v2706_v62, %v1310_v21  ;;  %v1302_v27 = vadd.f32 %v1301_v25, %v1180_v46  ;;  %2415 = vtanh.f32 %v1349_v20 }
 0x572   :  { %v2223_v13 = vpop.f32.mrf.mxu1 }
 0x573   :  { %v1350_v14 = vadd.f32 %v2706_v62, %v1302_v27  ;;  %2417 = vtanh.f32 %v1352_v26  ;;  %v1323_v30 = vadd.f32 %v2223_v13, %v2203_v44 }
 0x574   :  { %v1314_v29 = vpop.f32.mrf.mxu1 }
 0x575   :  { %2419 = vtanh.f32 %v1350_v14  ;;  %v1315_v24 = vadd.f32 %v1314_v29, %v1193_v61  ;;  %v1355_v36 = vadd.f32 %v2706_v62, %v1323_v30 }
 0x576   :  { %2421 = vtanh.f32 %v1351_v28  ;;  %v2224_v15 = vpop.f32.mrf.mxu1  ;;  %v2408_v17 = vpop.eup %2407 }
 0x577   :  { %v1353_v31 = vadd.f32 %v2706_v62, %v1315_v24  ;;  %v1326_v16 = vadd.f32 %v2224_v15, %v2204_v8 }
 0x578   :  { %v1317_v19 = vpop.f32.mrf.mxu1  ;;  %v2410_v32 = vpop.eup %2409 }
 0x579   :  { %v1356_v33 = vadd.f32 %v2706_v62, %v1326_v16  ;;  %v1318_v34 = vadd.f32 %v1317_v19, %v1196_v23  ;;  %2423 = vtanh.f32 %v1353_v31 }
 0x57a   :  { %v2412_v35 = vpop.eup %2411  ;;  %v2227_v37 = vpop.f32.mrf.mxu1 }
 0x57b   :  { %v2414_v5 = vpop.eup %2413  ;;  %v1354_v38 = vadd.f32 %v2706_v62, %v1318_v34  ;;  %v1377_v39 = vpack.c.bf16 %v2412_v35, %v2408_v17  ;;  %2425 = vtanh.f32 %v1356_v33  ;;  %v1339_v52 = vadd.f32 %v2227_v37, %v2207_v22  ;;  %v2440_v34 = vld [vmem:[%s2905_s0 + $0x8] sm:$0xff]   ;;  %v2441_v35 = vld [vmem:[%s2905_s0 + $0x10] sm:$0xff]   ;;  %v2443_v37 = vld [vmem:[%s2905_s0 + $0x20] sm:$0xff]  }
 0x57c   :  { %v1378_v41 = vpack.c.bf16 %v2410_v32, %v2414_v5  ;;  %v1330_v42 = vpop.f32.mrf.mxu1  ;;  %v2444_v5 = vld [vmem:[%s2905_s0 + $0x28] sm:$0xff]  }
 0x57d   :  { %2427 = vtanh.f32 %v1354_v38  ;;  %v1331_v43 = vadd.f32 %v1330_v42, %v1209_v18  ;;  %2233 = vmatprep.mubr.msk.bf16.mxu0 %vm703_vm2, %v1377_v39  ;;  %2253 = vmatprep.mubr.msk.bf16.mxu1 %vm703_vm2, %v1377_v39  ;;  %v1359_v58 = vadd.f32 %v2706_v62, %v1339_v52  ;;  %v2445_v38 = vld [vmem:[%s2905_s0 + $0x30] sm:$0xff]   ;;  %v2446_v39 = vld [vmem:[%s2905_s0 + $0x38] sm:$0xff]  }
 0x57e   :  { %2429 = vtanh.f32 %v1355_v36  ;;  %v2228_v50 = vpop.f32.mrf.mxu1  ;;  %2234 = vmatmul.mubr.msk.bf16.vlgmr.msra.gmra.mxu0 %vm703_vm2, %v1378_v41  ;;  %2254 = vmatmul.mubr.msk.bf16.vlgmr.msra.gmra.mxu1 %vm703_vm2, %v1378_v41  ;;  %v2416_v48 = vpop.eup %2415  ;;  %v2442_v36 = vld [vmem:[%s2905_s0 + $0x18] sm:$0xff]  }
 0x57f   :  { %v1357_v53 = vadd.f32 %v2706_v62, %v1331_v43  ;;  %v1342_v54 = vadd.f32 %v2228_v50, %v2208_v40 }
 0x580   :  { %v1333_v56 = vpop.f32.mrf.mxu1  ;;  %v2418_v51 = vpop.eup %2417 }
 0x581   :  { %v1360_v57 = vadd.f32 %v2706_v62, %v1342_v54  ;;  %v1334_v49 = vadd.f32 %v1333_v56, %v1212_v55  ;;  %2431 = vtanh.f32 %v1357_v53  ;;  %v2822_v55 = vld [vmem:[%s2914_s10] ss:$0 sm:$0xff] }
 0x582   :  { %v2420_v46 = vpop.eup %2419 }
 0x583   :  { %v2422_v44 = vpop.eup %2421  ;;  %v1358_v59 = vadd.f32 %v2706_v62, %v1334_v49  ;;  %v1379_v47 = vpack.c.bf16 %v2420_v46, %v2416_v48  ;;  %2433 = vtanh.f32 %v1360_v57 }
 0x584   :  { %v1380_v60 = vpack.c.bf16 %v2418_v51, %v2422_v44 }
 0x585   :  { %2435 = vtanh.f32 %v1358_v59  ;;  %2237 = vmatprep.mubr.msk.bf16.mxu0 %vm703_vm2, %v1379_v47  ;;  %2257 = vmatprep.mubr.msk.bf16.mxu1 %vm703_vm2, %v1379_v47 }
 0x586   :  { %2437 = vtanh.f32 %v1359_v58  ;;  %2238 = vmatmul.mubr.msk.bf16.gmra.mxu0 %vm703_vm2, %v1380_v60  ;;  %2258 = vmatmul.mubr.msk.bf16.gmra.mxu1 %vm703_vm2, %v1380_v60  ;;  %v2424_v63 = vpop.eup %2423 }
 0x588   :  { %v2426_v0 = vpop.eup %2425 }
 0x58a   :  { %v2428_v45 = vpop.eup %2427 }
 0x58b   :  { %v2430_v61 = vpop.eup %2429  ;;  %v1381_v1 = vpack.c.bf16 %v2428_v45, %v2424_v63 }
 0x58c   :  { %v1382_v2 = vpack.c.bf16 %v2426_v0, %v2430_v61 }
 0x58d   :  { %2241 = vmatprep.mubr.msk.bf16.mxu0 %vm703_vm2, %v1381_v1  ;;  %2261 = vmatprep.mubr.msk.bf16.mxu1 %vm703_vm2, %v1381_v1 }
 0x58e   :  { %2242 = vmatmul.mubr.msk.bf16.gmra.mxu0 %vm703_vm2, %v1382_v2  ;;  %2262 = vmatmul.mubr.msk.bf16.gmra.mxu1 %vm703_vm2, %v1382_v2  ;;  %v2432_v62 = vpop.eup %2431 }
 0x590   :  { %v2434_v3 = vpop.eup %2433 }
 0x592   :  { %v2436_v4 = vpop.eup %2435 }
 0x593   :  { %v2438_v6 = vpop.eup %2437  ;;  %v1383_v7 = vpack.c.bf16 %v2436_v4, %v2432_v62 }
 0x594   :  { %v1384_v8 = vpack.c.bf16 %v2434_v3, %v2438_v6 }
 0x595   :  { %2245 = vmatprep.mubr.msk.bf16.mxu0 %vm703_vm2, %v1383_v7  ;;  %2265 = vmatprep.mubr.msk.bf16.mxu1 %vm703_vm2, %v1383_v7 }
 0x596   :  { %2246 = vmatmul.mubr.msk.bf16.gmra.mxu0 %vm703_vm2, %v1384_v8  ;;  %2266 = vmatmul.mubr.msk.bf16.gmra.mxu1 %vm703_vm2, %v1384_v8 }
 0x597   :  { %2285 = vmatprep.mubr.bf16.mxu0 %v2439_v9 }
 0x63e   :  { %v2235_v10 = vpop.f32.mrf.mxu0  ;;  %v2255_v40 = vpop.f32.mrf.mxu1 }
 0x640   :  { %v1459_v11 = vpop.f32.mrf.mxu0  ;;  %v1580_v41 = vpop.f32.mrf.mxu1 }
 0x642   :  { %v2236_v12 = vpop.f32.mrf.mxu0  ;;  %v2256_v42 = vpop.f32.mrf.mxu1 }
 0x643   :  { %v1523_v32 = vpack.c.bf16 %v2236_v12, %v2235_v10 }
 0x644   :  { %v1462_v20 = vpop.f32.mrf.mxu0  ;;  %v1583_v43 = vpop.f32.mrf.mxu1 }
 0x645   :  { %v1522_v33 = vpack.c.bf16 %v1462_v20, %v1459_v11 }
 0x646   :  { %v2239_v21 = vpop.f32.mrf.mxu0  ;;  %v2259_v52 = vpop.f32.mrf.mxu1 }
 0x648   :  { %v1475_v23 = vpop.f32.mrf.mxu0  ;;  %v1596_v50 = vpop.f32.mrf.mxu1 }
 0x64a   :  { %v2240_v25 = vpop.f32.mrf.mxu0  ;;  %v2260_v53 = vpop.f32.mrf.mxu1 }
 0x64b   :  { %v1525_v18 = vpack.c.bf16 %v2240_v25, %v2239_v21 }
 0x64c   :  { %v1478_v26 = vpop.f32.mrf.mxu0  ;;  %v1599_v54 = vpop.f32.mrf.mxu1 }
 0x64d   :  { %v1524_v19 = vpack.c.bf16 %v1478_v26, %v1475_v23 }
 0x64e   :  { %v2243_v27 = vpop.f32.mrf.mxu0  ;;  %v2263_v51 = vpop.f32.mrf.mxu1 }
 0x650   :  { %v1491_v28 = vpop.f32.mrf.mxu0  ;;  %v1612_v47 = vpop.f32.mrf.mxu1 }
 0x652   :  { %v2244_v13 = vpop.f32.mrf.mxu0  ;;  %v2264_v2 = vpop.f32.mrf.mxu1 }
 0x653   :  { %v1527_v16 = vpack.c.bf16 %v2244_v13, %v2243_v27 }
 0x654   :  { %v1494_v14 = vpop.f32.mrf.mxu0  ;;  %v1615_v9 = vpop.f32.mrf.mxu1 }
 0x655   :  { %v1526_v17 = vpack.c.bf16 %v1494_v14, %v1491_v28 }
 0x656   :  { %v2247_v22 = vpop.f32.mrf.mxu0  ;;  %v2267_v25 = vpop.f32.mrf.mxu1 }
 0x658   :  { %v1507_v29 = vpop.f32.mrf.mxu0 }
 0x65a   :  { %v2248_v24 = vpop.f32.mrf.mxu0 }
 0x65b   :  { %v1529_v30 = vpack.c.bf16 %v2248_v24, %v2247_v22 }
 0x65c   :  { %v1510_v15 = vpop.f32.mrf.mxu0 }
 0x65d   :  { %v1528_v31 = vpack.c.bf16 %v1510_v15, %v1507_v29  ;;  %2269 = vmatprep.subr.bf16.mxu0 %v1529_v30  ;;  %v1628_v29 = vpop.f32.mrf.mxu1 }
 0x65e   :  { %2270 = vmatpush3.bf16.msra.mxu0 %v1529_v30 }
 0x65f   :  { %2271 = vmatprep.subr.bf16.mxu0 %v1528_v31 }
 0x662   :  { %2272 = vmatpush3.bf16.msra.mxu0 %v1528_v31 }
 0x663   :  { %2273 = vmatprep.subr.bf16.mxu0 %v1527_v16 }
 0x666   :  { %2274 = vmatpush3.bf16.msra.mxu0 %v1527_v16 }
 0x667   :  { %2275 = vmatprep.subr.bf16.mxu0 %v1526_v17 }
 0x66a   :  { %2276 = vmatpush3.bf16.msra.mxu0 %v1526_v17 }
 0x66b   :  { %2277 = vmatprep.subr.bf16.mxu0 %v1525_v18 }
 0x66e   :  { %2278 = vmatpush3.bf16.msra.mxu0 %v1525_v18  ;;  %v2268_v18 = vpop.f32.mrf.mxu1 }
 0x66f   :  { %2279 = vmatprep.subr.bf16.mxu0 %v1524_v19 }
 0x672   :  { %2280 = vmatpush3.bf16.msra.mxu0 %v1524_v19 }
 0x673   :  { %2281 = vmatprep.subr.bf16.mxu0 %v1523_v32 }
 0x676   :  { %2282 = vmatpush3.bf16.msra.mxu0 %v1523_v32 }
 0x677   :  { %2283 = vmatprep.subr.bf16.mxu0 %v1522_v33 }
 0x67a   :  { %2284 = vmatpush3.bf16.msra.mxu0 %v1522_v33 }
 0x67d   :  { %2286 = vmatmul.mubr.bf16.vlgmr.msra.gmra.mxu0 %v2440_v34 }
 0x67e   :  { %2289 = vmatprep.mubr.bf16.mxu0 %v2441_v35 }
 0x685   :  { %2290 = vmatmul.mubr.bf16.gmra.mxu0 %v2442_v36 }
 0x686   :  { %2293 = vmatprep.mubr.bf16.mxu0 %v2443_v37  ;;  %v1631_v37 = vpop.f32.mrf.mxu1 }
 0x68d   :  { %2294 = vmatmul.mubr.bf16.gmra.mxu0 %v2444_v5 }
 0x68e   :  { %2297 = vmatprep.mubr.bf16.mxu0 %v2445_v38 }
 0x695   :  { %2298 = vmatmul.mubr.bf16.gmra.mxu0 %v2446_v39 }
 0x73d   :  { %v2287_v48 = vpop.f32.mrf.mxu0 }
 0x73e   :  { %v1686_v56 = vadd.f32 %v2287_v48, %v2255_v40 }
 0x73f   :  { %v1677_v57 = vpop.f32.mrf.mxu0 }
 0x740   :  { %v1749_v49 = vadd.f32 %v2822_v55, %v1686_v56  ;;  %v1678_v46 = vadd.f32 %v1677_v57, %v1580_v41 }
 0x741   :  { %v2288_v58 = vpop.f32.mrf.mxu0 }
 0x742   :  { %1766 = vst.msk [vmem:[%s2915_s11 + $0x10] sm:$0xff] %vm1763_vm3, %v1749_v49  ;;  %v1747_v44 = vadd.f32 %v2822_v55, %v1678_v46  ;;  %v1689_v59 = vadd.f32 %v2288_v58, %v2256_v42 }
 0x743   :  { %v1680_v60 = vpop.f32.mrf.mxu0 }
 0x744   :  { %1764 = vst.msk [vmem:[%s2915_s11] sm:$0xff] %vm1763_vm3, %v1747_v44  ;;  %v1750_v63 = vadd.f32 %v2822_v55, %v1689_v59  ;;  %v1681_v0 = vadd.f32 %v1680_v60, %v1583_v43 }
 0x745   :  { %v2291_v45 = vpop.f32.mrf.mxu0 }
 0x746   :  { %1767 = vst.msk [vmem:[%s2915_s11 + $0x18] sm:$0xff] %vm1763_vm3, %v1750_v63  ;;  %v1748_v61 = vadd.f32 %v2822_v55, %v1681_v0  ;;  %v1702_v1 = vadd.f32 %v2291_v45, %v2259_v52 }
 0x747   :  { %v1693_v62 = vpop.f32.mrf.mxu0 }
 0x748   :  { %1765 = vst.msk [vmem:[%s2915_s11 + $0x8] sm:$0xff] %vm1763_vm3, %v1748_v61  ;;  %v1753_v3 = vadd.f32 %v2822_v55, %v1702_v1  ;;  %v1694_v4 = vadd.f32 %v1693_v62, %v1596_v50 }
 0x749   :  { %v2292_v6 = vpop.f32.mrf.mxu0 }
 0x74a   :  { %1770 = vst.msk [vmem:[%s2915_s11 + $0x30] sm:$0xff] %vm1763_vm3, %v1753_v3  ;;  %v1751_v7 = vadd.f32 %v2822_v55, %v1694_v4  ;;  %v1705_v8 = vadd.f32 %v2292_v6, %v2260_v53 }
 0x74b   :  { %v1696_v10 = vpop.f32.mrf.mxu0 }
 0x74c   :  { %1768 = vst.msk [vmem:[%s2915_s11 + $0x20] sm:$0xff] %vm1763_vm3, %v1751_v7  ;;  %v1754_v11 = vadd.f32 %v2822_v55, %v1705_v8  ;;  %v1697_v12 = vadd.f32 %v1696_v10, %v1599_v54 }
 0x74d   :  { %v2295_v20 = vpop.f32.mrf.mxu0 }
 0x74e   :  { %1771 = vst.msk [vmem:[%s2915_s11 + $0x38] sm:$0xff] %vm1763_vm3, %v1754_v11  ;;  %v1752_v21 = vadd.f32 %v2822_v55, %v1697_v12  ;;  %v1718_v23 = vadd.f32 %v2295_v20, %v2263_v51 }
 0x74f   :  { %v1709_v26 = vpop.f32.mrf.mxu0 }
 0x750   :  { %1769 = vst.msk [vmem:[%s2915_s11 + $0x28] sm:$0xff] %vm1763_vm3, %v1752_v21  ;;  %v1757_v27 = vadd.f32 %v2822_v55, %v1718_v23  ;;  %v1710_v28 = vadd.f32 %v1709_v26, %v1612_v47 }
 0x751   :  { %v2296_v13 = vpop.f32.mrf.mxu0 }
 0x752   :  { %1774 = vst.msk [vmem:[%s2915_s11 + $0x50] sm:$0xff] %vm1763_vm3, %v1757_v27  ;;  %v1755_v14 = vadd.f32 %v2822_v55, %v1710_v28  ;;  %v1721_v22 = vadd.f32 %v2296_v13, %v2264_v2 }
 0x753   :  { %v1712_v24 = vpop.f32.mrf.mxu0 }
 0x754   :  { %1772 = vst.msk [vmem:[%s2915_s11 + $0x40] sm:$0xff] %vm1763_vm3, %v1755_v14  ;;  %v1758_v30 = vadd.f32 %v2822_v55, %v1721_v22  ;;  %v1713_v15 = vadd.f32 %v1712_v24, %v1615_v9 }
 0x755   :  { %v2299_v31 = vpop.f32.mrf.mxu0 }
 0x756   :  { %1775 = vst.msk [vmem:[%s2915_s11 + $0x58] sm:$0xff] %vm1763_vm3, %v1758_v30  ;;  %v1756_v16 = vadd.f32 %v2822_v55, %v1713_v15  ;;  %v1734_v17 = vadd.f32 %v2299_v31, %v2267_v25 }
 0x757   :  { %v1725_v19 = vpop.f32.mrf.mxu0 }
 0x758   :  { %1773 = vst.msk [vmem:[%s2915_s11 + $0x48] sm:$0xff] %vm1763_vm3, %v1756_v16  ;;  %v1761_v32 = vadd.f32 %v2822_v55, %v1734_v17  ;;  %v1726_v33 = vadd.f32 %v1725_v19, %v1628_v29 }
 0x759   :  { %v2300_v34 = vpop.f32.mrf.mxu0 }
 0x75a   :  { %1778 = vst.msk [vmem:[%s2915_s11 + $0x70] sm:$0xff] %vm1763_vm3, %v1761_v32  ;;  %v1759_v35 = vadd.f32 %v2822_v55, %v1726_v33  ;;  %v1737_v36 = vadd.f32 %v2300_v34, %v2268_v18 }
 0x75b   :  { %v1728_v5 = vpop.f32.mrf.mxu0 }
 0x75c   :  { %1776 = vst.msk [vmem:[%s2915_s11 + $0x60] sm:$0xff] %vm1763_vm3, %v1759_v35  ;;  %v1762_v38 = vadd.f32 %v2822_v55, %v1737_v36  ;;  %v1729_v39 = vadd.f32 %v1728_v5, %v1631_v37 }
 0x75e   :  { %1779 = vst.msk [vmem:[%s2915_s11 + $0x78] sm:$0xff] %vm1763_vm3, %v1762_v38  ;;  %v1760_v40 = vadd.f32 %v2822_v55, %v1729_v39 }
 0x760   :  { %1777 = vst.msk [vmem:[%s2915_s11 + $0x68] sm:$0xff] %vm1763_vm3, %v1760_v40 }

</bundles_post_ra>
